<compile_context>
chip_gen: v6e
topology: v6e:2x2x1
jax: 0.10.0
libtpu: 0.0.40
codegen_flags: <defaults>
</compile_context>

<pallas_src>
import functools

import jax
import jax.numpy as jnp
from jax.experimental import pallas as pl
from jax.experimental.pallas import tpu as pltpu


def _conv1d_relu(x_ref, w_ref, b_ref, acc_ref, *, K, padding):
    """Conv1d (+bias) + ReLU for one batch element via K per-tap MXU matmuls.

    x_ref   : (1, C_in, L)      unpadded input slab (compute dtype), NCL
    w_ref   : (K, C_out, C_in)  w_ref[k, f, c] = weight[f, c, k] (compute dtype)
    b_ref   : (C_out, 1)        conv bias, f32
    acc_ref : (C_out, L_out)    f32 VMEM accumulator scratch
    returns : (C_out, L_out)    f32 post-ReLU activations
    """
    L = x_ref.shape[2]
    C_out, L_out = acc_ref.shape

    acc_ref[...] = jnp.zeros_like(acc_ref)
    # K is small & static -> unrolled.  Zero padding is handled by restricting
    # each tap's output-column range (pad columns contribute 0, so they are
    # simply skipped) -- no padded copy of x is ever built.
    for k in range(K):
        j_lo = max(0, padding - k)               # first valid output column
        j_hi = min(L_out, L + padding - k)       # one past last valid column
        if j_hi <= j_lo:                         # tap entirely in the padding
            continue
        x_lo = j_lo + k - padding                # matching input column
        n = j_hi - j_lo
        part = jnp.dot(w_ref[k], x_ref[0, :, x_lo:x_lo + n],
                       preferred_element_type=jnp.float32)   # (C_out, n) f32
        acc_ref[:, j_lo:j_hi] += part

    return jnp.maximum(acc_ref[...] + b_ref[...], 0.0)        # bias + ReLU


def _conv_relu_stats_kernel(x_ref, w_ref, b_ref, stats_ref, acc_ref,
                            *, K, padding):
    """Pass 1 (one batch element per grid step): stats only, activation not stored.

    stats_ref : (1, 2, C_out)  row 0 = sum over L_out, row 1 = sum of squares.
                C_out sits on the lane axis -> lane-dense full-row stores.
    """
    act = _conv1d_relu(x_ref, w_ref, b_ref, acc_ref, K=K, padding=padding)
    # NOTE: variance is later formed as E[x^2]-mean^2 in f32; with non-negative
    # (ReLU'd) activations and huge B*L_out this can cancel -- acceptable here,
    # clamped to >= 0 in the wrapper.
    stats_ref[0, 0, :] = jnp.sum(act, axis=1)
    stats_ref[0, 1, :] = jnp.sum(act * act, axis=1)


def _conv_relu_bn_kernel(x_ref, w_ref, b_ref, scale_ref, shift_ref, o_ref,
                         acc_ref, *, K, padding):
    """Pass 2 (one batch element per grid step): recompute conv+ReLU, apply the
    folded BatchNorm affine, and write the final output once (lane axis = L_out)."""
    act = _conv1d_relu(x_ref, w_ref, b_ref, acc_ref, K=K, padding=padding)
    o_ref[0] = (act * scale_ref[...] + shift_ref[...]).astype(o_ref.dtype)


def _vmem_limit_bytes():
    """Generation-aware VMEM budget: ~half of physical capacity, capped at 100 MiB,
    floored at 32 MiB (v5e/v6e -> 64 MiB, v7x -> 32 MiB)."""
    try:
        cap = pltpu.get_tpu_info().vmem_capacity_bytes
        return int(max(32 * 1024 * 1024, min(cap // 2, 100 * 1024 * 1024)))
    except Exception:  # pragma: no cover - conservative fallback
        return 32 * 1024 * 1024


def bn_conv_relu(x, weight, bias, gamma, beta, *, padding, eps=1e-5,
                 compute_dtype=None, return_batch_stats=False):
    """Conv1d -> ReLU -> BatchNorm1d (training-mode batch statistics) forward.

    x      : (B, C_in, L)  PyTorch NCL layout, kept end to end (no transposes).
    weight : (C_out, C_in, K);  bias, gamma, beta : (C_out,)
    compute_dtype : dtype of the MXU operands (pass jnp.bfloat16 in production
                    for bandwidth / MXU rate); accumulation, statistics and the
                    BN affine always stay in f32.
    """
    B, C_in, L = x.shape
    C_out, _, K = weight.shape
    L_out = L + 2 * padding - K + 1
    if compute_dtype is None:
        compute_dtype = x.dtype

    x_c = x.astype(compute_dtype)
    # (K, C_out, C_in): w_t[k, f, c] = weight[f, c, k]  -> per-tap (C_out, C_in) slabs.
    w_t = jnp.transpose(weight, (2, 0, 1)).astype(compute_dtype)
    b2 = bias.reshape(C_out, 1).astype(jnp.float32)

    cparams = pltpu.CompilerParams(
        dimension_semantics=("parallel",),       # shard batch across TCs (v7x)
        vmem_limit_bytes=_vmem_limit_bytes())

    # ---- Pass 1: conv + ReLU (recomputed only) -> per-channel partial stats ----
    # If an xprof trace shows exposed input DMA here, bump the x BlockSpec with
    # pipeline_mode=pl.Buffered(3).
    stats = pl.pallas_call(
        functools.partial(_conv_relu_stats_kernel, K=K, padding=padding),
        grid=(B,),
        in_specs=[
            pl.BlockSpec((1, C_in, L), lambda b: (b, 0, 0)),
            pl.BlockSpec((K, C_out, C_in), lambda b: (0, 0, 0)),
            pl.BlockSpec((C_out, 1), lambda b: (0, 0)),
        ],
        out_specs=pl.BlockSpec((1, 2, C_out), lambda b: (b, 0, 0)),
        out_shape=jax.ShapeDtypeStruct((B, 2, C_out), jnp.float32),
        scratch_shapes=[pltpu.VMEM((C_out, L_out), jnp.float32)],
        compiler_params=cparams,
    )(x_c, w_t, b2)

    # ---- Folded BN coefficients (tiny per-channel math, plain JAX, f32) ----
    n = float(B * L_out)
    ch_sum = jnp.sum(stats[:, 0, :], axis=0)                    # (C_out,)
    ch_sumsq = jnp.sum(stats[:, 1, :], axis=0)                  # (C_out,)
    mean = ch_sum / n
    var = jnp.maximum(ch_sumsq / n - mean * mean, 0.0)          # biased, as PyTorch fwd
    scale = gamma.astype(jnp.float32) * jax.lax.rsqrt(var + eps)
    shift = beta.astype(jnp.float32) - mean * scale

    # ---- Pass 2: recompute conv + ReLU, apply affine, write output once ----
    out = pl.pallas_call(
        functools.partial(_conv_relu_bn_kernel, K=K, padding=padding),
        grid=(B,),
        in_specs=[
            pl.BlockSpec((1, C_in, L), lambda b: (b, 0, 0)),
            pl.BlockSpec((K, C_out, C_in), lambda b: (0, 0, 0)),
            pl.BlockSpec((C_out, 1), lambda b: (0, 0)),
            pl.BlockSpec((C_out, 1), lambda b: (0, 0)),
            pl.BlockSpec((C_out, 1), lambda b: (0, 0)),
        ],
        out_specs=pl.BlockSpec((1, C_out, L_out), lambda b: (b, 0, 0)),
        out_shape=jax.ShapeDtypeStruct((B, C_out, L_out), x.dtype),
        scratch_shapes=[pltpu.VMEM((C_out, L_out), jnp.float32)],
        compiler_params=cparams,
    )(x_c, w_t, b2, scale.reshape(C_out, 1), shift.reshape(C_out, 1))

    if return_batch_stats:
        var_unbiased = var * (n / max(n - 1.0, 1.0))
        return out, mean, var_unbiased
    return out


def _reference(x, weight, bias, gamma, beta, padding, eps=1e-5):
    """Pure-JAX reference matching PyTorch Conv1d -> ReLU -> BatchNorm1d(train)."""
    y = jax.lax.conv_general_dilated(
        x, weight, window_strides=(1,), padding=[(padding, padding)],
        dimension_numbers=('NCH', 'OIH', 'NCH'))
    y = y + bias[None, :, None]
    y = jnp.maximum(y, 0.0)
    mean = jnp.mean(y, axis=(0, 2), keepdims=True)
    var = jnp.mean((y - mean) ** 2, axis=(0, 2), keepdims=True)
    return ((y - mean) / jnp.sqrt(var + eps)
            * gamma[None, :, None] + beta[None, :, None])


if __name__ == "__main__":
    # Small shapes consistent with the module: B=2, C_in=4, L=16, C_out=8, K=3, P=1.
    B, C_in, L = 2, 4, 16
    C_out, K, P = 8, 3, 1

    key = jax.random.PRNGKey(0)
    kx, kw, kb, kg, kbt = jax.random.split(key, 5)
    x = jax.random.normal(kx, (B, C_in, L), jnp.float32)
    weight = jax.random.uniform(kw, (C_out, C_in, K), jnp.float32,
                                minval=-0.3, maxval=0.3)
    bias = jax.random.uniform(kb, (C_out,), jnp.float32, minval=-0.1, maxval=0.1)
    gamma = 1.0 + 0.1 * jax.random.normal(kg, (C_out,), jnp.float32)
    beta = 0.1 * jax.random.normal(kbt, (C_out,), jnp.float32)

    ref = _reference(x, weight, bias, gamma, beta, P)

    # f32 path (exact-ish vs reference).
    out = bn_conv_relu(x, weight, bias, gamma, beta, padding=P)
    out = jax.block_until_ready(out)
    assert out.shape == (B, C_out, L + 2 * P - K + 1)
    assert jnp.allclose(out, ref, atol=1e-4, rtol=1e-4), "f32 mismatch vs reference"

    # bf16-operand path (production bandwidth / MXU-rate mode), loose tolerance.
    out_bf16 = bn_conv_relu(x, weight, bias, gamma, beta, padding=P,
                            compute_dtype=jnp.bfloat16)
    out_bf16 = jax.block_until_ready(out_bf16)
    assert jnp.allclose(out_bf16, ref, atol=1e-1, rtol=1e-1), "bf16 mismatch vs reference"

    print("KERNEL_OK")
</pallas_src>

<mosaic_0001>
module attributes {stable_mosaic.version = 11 : i64} {
  func.func @_conv_relu_stats_kernel(%arg0: i32, %arg1: memref<1x4x16xf32, #tpu.memory_space<vmem>>, %arg2: memref<3x8x4xf32, #tpu.memory_space<vmem>>, %arg3: memref<8x1xf32, #tpu.memory_space<vmem>>, %arg4: memref<1x2x8xf32, #tpu.memory_space<vmem>>, %arg5: memref<8x16xf32, #tpu.memory_space<vmem>>) attributes {dimension_semantics = [#tpu.dimension_semantics<parallel>], iteration_bounds = array<i64: 2>, scalar_prefetch = 0 : i64, scratch_operands = 1 : i64, tpu.core_type = #tpu.core_type<tc>, window_params = [{transform_indices = @transform_0, window_bounds = array<i64: 1, 4, 16>}, {pipeline_mode = #tpu.pipeline_mode<synchronous>, transform_indices = @transform_1, window_bounds = array<i64: 3, 8, 4>}, {pipeline_mode = #tpu.pipeline_mode<synchronous>, transform_indices = @transform_2, window_bounds = array<i64: 8, 1>}, {transform_indices = @transform_3, window_bounds = array<i64: 1, 2, 8>}]} {
    %cst = arith.constant 0.000000e+00 : f32
    %0 = vector.broadcast %cst : f32 to vector<8x16xf32>
    %c0 = arith.constant 0 : index
    %c0_0 = arith.constant 0 : index
    %1 = vector.load %arg5[%c0, %c0_0] : memref<8x16xf32, #tpu.memory_space<vmem>>, vector<8x16xf32>
    tpu.vector_store %arg5[%c0, %c0_0], %0 {strides = array<i32>} : memref<8x16xf32, #tpu.memory_space<vmem>>, vector<8x16xf32>,
    %c0_1 = arith.constant 0 : index
    %c0_2 = arith.constant 0 : index
    %c0_3 = arith.constant 0 : index
    %2 = vector.load %arg2[%c0_1, %c0_2, %c0_3] : memref<3x8x4xf32, #tpu.memory_space<vmem>>, vector<1x8x4xf32>
    %3 = vector.shape_cast %2 : vector<1x8x4xf32> to vector<8x4xf32>
    %c0_4 = arith.constant 0 : index
    %c0_5 = arith.constant 0 : index
    %c0_6 = arith.constant 0 : index
    %4 = vector.load %arg1[%c0_4, %c0_5, %c0_6] : memref<1x4x16xf32, #tpu.memory_space<vmem>>, vector<1x4x15xf32>
    %5 = vector.shape_cast %4 : vector<1x4x15xf32> to vector<4x15xf32>
    %cst_7 = arith.constant dense<0.000000e+00> : vector<8x15xf32>
    %6 = tpu.matmul %3, %5, %cst_7 {dimension_numbers = #tpu.dot_dimension_numbers<[1], [0], [0], [1], [0, 0, 1, 1], [], []>} : vector<8x4xf32>, vector<4x15xf32>, vector<8x15xf32> -> vector<8x15xf32>
    %c0_8 = arith.constant 0 : index
    %c1 = arith.constant 1 : index
    %7 = vector.load %arg5[%c0_8, %c1] : memref<8x16xf32, #tpu.memory_space<vmem>>, vector<8x15xf32>
    %8 = arith.addf %7, %6 : vector<8x15xf32>
    %c0_9 = arith.constant 0 : index
    %c1_10 = arith.constant 1 : index
    %9 = vector.load %arg5[%c0_9, %c1_10] : memref<8x16xf32, #tpu.memory_space<vmem>>, vector<8x15xf32>
    tpu.vector_store %arg5[%c0_9, %c1_10], %8 {strides = array<i32>} : memref<8x16xf32, #tpu.memory_space<vmem>>, vector<8x15xf32>,
    %c1_11 = arith.constant 1 : index
    %c0_12 = arith.constant 0 : index
    %c0_13 = arith.constant 0 : index
    %10 = vector.load %arg2[%c1_11, %c0_12, %c0_13] : memref<3x8x4xf32, #tpu.memory_space<vmem>>, vector<1x8x4xf32>
    %11 = vector.shape_cast %10 : vector<1x8x4xf32> to vector<8x4xf32>
    %c0_14 = arith.constant 0 : index
    %c0_15 = arith.constant 0 : index
    %c0_16 = arith.constant 0 : index
    %12 = vector.load %arg1[%c0_14, %c0_15, %c0_16] : memref<1x4x16xf32, #tpu.memory_space<vmem>>, vector<1x4x16xf32>
    %13 = vector.shape_cast %12 : vector<1x4x16xf32> to vector<4x16xf32>
    %cst_17 = arith.constant dense<0.000000e+00> : vector<8x16xf32>
    %14 = tpu.matmul %11, %13, %cst_17 {dimension_numbers = #tpu.dot_dimension_numbers<[1], [0], [0], [1], [0, 0, 1, 1], [], []>} : vector<8x4xf32>, vector<4x16xf32>, vector<8x16xf32> -> vector<8x16xf32>
    %c0_18 = arith.constant 0 : index
    %c0_19 = arith.constant 0 : index
    %15 = vector.load %arg5[%c0_18, %c0_19] : memref<8x16xf32, #tpu.memory_space<vmem>>, vector<8x16xf32>
    %16 = arith.addf %15, %14 : vector<8x16xf32>
    %c0_20 = arith.constant 0 : index
    %c0_21 = arith.constant 0 : index
    %17 = vector.load %arg5[%c0_20, %c0_21] : memref<8x16xf32, #tpu.memory_space<vmem>>, vector<8x16xf32>
    tpu.vector_store %arg5[%c0_20, %c0_21], %16 {strides = array<i32>} : memref<8x16xf32, #tpu.memory_space<vmem>>, vector<8x16xf32>,
    %c2 = arith.constant 2 : index
    %c0_22 = arith.constant 0 : index
    %c0_23 = arith.constant 0 : index
    %18 = vector.load %arg2[%c2, %c0_22, %c0_23] : memref<3x8x4xf32, #tpu.memory_space<vmem>>, vector<1x8x4xf32>
    %19 = vector.shape_cast %18 : vector<1x8x4xf32> to vector<8x4xf32>
    %c0_24 = arith.constant 0 : index
    %c0_25 = arith.constant 0 : index
    %c1_26 = arith.constant 1 : index
    %20 = vector.load %arg1[%c0_24, %c0_25, %c1_26] : memref<1x4x16xf32, #tpu.memory_space<vmem>>, vector<1x4x15xf32>
    %21 = vector.shape_cast %20 : vector<1x4x15xf32> to vector<4x15xf32>
    %cst_27 = arith.constant dense<0.000000e+00> : vector<8x15xf32>
    %22 = tpu.matmul %19, %21, %cst_27 {dimension_numbers = #tpu.dot_dimension_numbers<[1], [0], [0], [1], [0, 0, 1, 1], [], []>} : vector<8x4xf32>, vector<4x15xf32>, vector<8x15xf32> -> vector<8x15xf32>
    %c0_28 = arith.constant 0 : index
    %c0_29 = arith.constant 0 : index
    %23 = vector.load %arg5[%c0_28, %c0_29] : memref<8x16xf32, #tpu.memory_space<vmem>>, vector<8x15xf32>
    %24 = arith.addf %23, %22 : vector<8x15xf32>
    %c0_30 = arith.constant 0 : index
    %c0_31 = arith.constant 0 : index
    %25 = vector.load %arg5[%c0_30, %c0_31] : memref<8x16xf32, #tpu.memory_space<vmem>>, vector<8x15xf32>
    tpu.vector_store %arg5[%c0_30, %c0_31], %24 {strides = array<i32>} : memref<8x16xf32, #tpu.memory_space<vmem>>, vector<8x15xf32>,
    %c0_32 = arith.constant 0 : index
    %c0_33 = arith.constant 0 : index
    %26 = vector.load %arg5[%c0_32, %c0_33] : memref<8x16xf32, #tpu.memory_space<vmem>>, vector<8x16xf32>
    %c0_34 = arith.constant 0 : index
    %c0_35 = arith.constant 0 : index
    %27 = vector.load %arg3[%c0_34, %c0_35] : memref<8x1xf32, #tpu.memory_space<vmem>>, vector<8x1xf32>
    %28 = vector.broadcast %27 : vector<8x1xf32> to vector<8x16xf32>
    %29 = arith.addf %26, %28 : vector<8x16xf32>
    %cst_36 = arith.constant 0.000000e+00 : f32
    %30 = vector.broadcast %cst_36 : f32 to vector<8x16xf32>
    %31 = arith.maximumf %29, %30 : vector<8x16xf32>
    %cst_37 = arith.constant dense<0.000000e+00> : vector<8xf32>
    %32 = vector.multi_reduction <add>, %31, %cst_37 [1] : vector<8x16xf32> to vector<8xf32>
    %c0_38 = arith.constant 0 : index
    %c0_39 = arith.constant 0 : index
    %c0_40 = arith.constant 0 : index
    %33 = vector.load %arg4[%c0_38, %c0_39, %c0_40] : memref<1x2x8xf32, #tpu.memory_space<vmem>>, vector<1x1x8xf32>
    %34 = vector.shape_cast %33 : vector<1x1x8xf32> to vector<8xf32>
    %35 = vector.shape_cast %32 : vector<8xf32> to vector<1x1x8xf32>
    tpu.vector_store %arg4[%c0_38, %c0_39, %c0_40], %35 {strides = array<i32>} : memref<1x2x8xf32, #tpu.memory_space<vmem>>, vector<1x1x8xf32>,
    %36 = arith.mulf %31, %31 : vector<8x16xf32>
    %cst_41 = arith.constant dense<0.000000e+00> : vector<8xf32>
    %37 = vector.multi_reduction <add>, %36, %cst_41 [1] : vector<8x16xf32> to vector<8xf32>
    %c0_42 = arith.constant 0 : index
    %c1_43 = arith.constant 1 : index
    %c0_44 = arith.constant 0 : index
    %38 = vector.load %arg4[%c0_42, %c1_43, %c0_44] : memref<1x2x8xf32, #tpu.memory_space<vmem>>, vector<1x1x8xf32>
    %39 = vector.shape_cast %38 : vector<1x1x8xf32> to vector<8xf32>
    %40 = vector.shape_cast %37 : vector<8xf32> to vector<1x1x8xf32>
    tpu.vector_store %arg4[%c0_42, %c1_43, %c0_44], %40 {strides = array<i32>} : memref<1x2x8xf32, #tpu.memory_space<vmem>>, vector<1x1x8xf32>,
    return
  }
  func.func @transform_0(%arg0: i32) -> (i32, i32, i32) {
    %c0_i32 = arith.constant 0 : i32
    %c0_i32_0 = arith.constant 0 : i32
    %c0_i32_1 = arith.constant 0 : i32
    return %arg0, %c0_i32, %c0_i32_0 : i32, i32, i32
  }
  func.func @transform_1(%arg0: i32) -> (i32, i32, i32) {
    %c0_i32 = arith.constant 0 : i32
    %c0_i32_0 = arith.constant 0 : i32
    %c0_i32_1 = arith.constant 0 : i32
    %c0_i32_2 = arith.constant 0 : i32
    return %c0_i32, %c0_i32_0, %c0_i32_1 : i32, i32, i32
  }
  func.func @transform_2(%arg0: i32) -> (i32, i32) {
    %c0_i32 = arith.constant 0 : i32
    %c0_i32_0 = arith.constant 0 : i32
    %c0_i32_1 = arith.constant 0 : i32
    return %c0_i32, %c0_i32_0 : i32, i32
  }
  func.func @transform_3(%arg0: i32) -> (i32, i32, i32) {
    %c0_i32 = arith.constant 0 : i32
    %c0_i32_0 = arith.constant 0 : i32
    %c0_i32_1 = arith.constant 0 : i32
    return %arg0, %c0_i32, %c0_i32_0 : i32, i32, i32
  }
}

</mosaic_0001>

<bundles_post_ra>
// kernel: tpu_custom_call.1
= control target key start
LH: loop header
LB: loop body
LE: loop exit
PB: predicated region body
PF: predicated region fallthrough
CT: control target
= control target key end

     0   :  { %8 = vsyncpa [#allocation4], 0  ;;  %s814_s0 = inlined_call_operand.vmem [shape: f32[2,4,16], index: 0, kind: input, shape index: {}]   ;;  %s815_s1 = inlined_call_operand.vmem [shape: f32[3,8,4], index: 1, kind: input, shape index: {}]   ;;  %s816_s2 = inlined_call_operand.vmem [shape: f32[8,1], index: 2, kind: input, shape index: {}]   ;;  %s817_s3 = inlined_call_operand.hbm [shape: f32[2,2,8], index: 3, kind: output, shape index: {}]  }
   0x1   :  { %10 = vsyncpa [#allocation4 + $0x1], 0  ;;  %s702_s12 = smov 0   ;;  %s704_s13 = smov 0  }
   0x2   :  { %s706_s14 = smov 0   ;;  %s708_s15 = smov 0  }
   0x3 LB: > { %s723_s16 = sadd.s32 4294967295, %s674_s15   ;;  %s529_s17 = sadd.s32 4294967294, %s674_s15   ;;  %s674_s15 = sphi %s708_s15, %s823_s15   ;;  %s670_s14 = sphi %s706_s14, %s822_s14   ;;  %s666_s13 = sphi %s704_s13, %s821_s13   ;;  %s662_s12 = sphi %s702_s12, %s820_s12  }
   0x4   : > { %s727_s18 = sadd.s32 1, %s674_s15   ;;  %s91_s19 = sadd.s32 1, %s670_s14 }
   0x5   : > { %s88_s20 = ssub.s32 %s674_s15, %s727_s18  ;;  %p101_p0 = scmp.ne.s32.totalorder %s670_s14, %s666_s13 }
   0x6   : > { %p89_p1 = scmp.eq.s32.totalorder %s88_s20, 0  ;;  %p102_p2 = scmp.eq.s32.totalorder %s723_s16, 1 }
   0x7   : > { %p107_p3 = scmp.ne.s32.totalorder %s666_s13, %s662_s12  ;;  %p108_p4 = scmp.eq.s32.totalorder %s529_s17, 1 }
   0x8   : > { %s738_s21 = scalar_select %p89_p1, %s670_s14, %s91_s19  }
   0x9   : > { %p740_p5 = por %p102_p2, %p101_p0  ;;  %p744_p6 = por %p108_p4, %p107_p3 }
   0xa   : > { %p532_p7 = scmp.ge.s32.totalorder %s674_s15, 1  ;;  %p139_p8 = scmp.lt.s32.totalorder %s674_s15, 3 }
   0xc   : > { %p140_p9 = pnand %p532_p7, %p139_p8 }
   0xd   : > { %p162_p10 = scmp.lt.s32.totalorder (!%p140_p9), %s723_s16, 1  ;;  %s678_s6 = smov (!%p140_p9), 127  }
   0xe   : > { %143 = sbr.rel (%p140_p9) target bundleno = 523 (0x20b), region = 32  ;;  %s680_s11 = smov (!%p140_p9), 1  }
   0xf   : > { %s159_s17 = sand.u32 (!%p140_p9), 1, %s666_s13   ;;  %s544_s20 = sshll.u32 (!%p140_p9), %s723_s16, 5 }
  0x10   : > { %s533_s19 = sshll.u32 (!%p140_p9), %s159_s17, 1  ;;  %s457_s29 = scalar_lea.sflag (!%p140_p9), [#allocation4], %s159_s17 }
  0x11   : > { %s681_s4 = smov (!%p140_p9), [#allocation3]  }
  0x13   : > { %v676_v0 = vmov 0.0   ;;  %vm677_vm0 = vmmov 0   ;;  %s163_s24 = scalar_select %p162_p10, %s723_s16, 1  ;;  %vm174_vm1 = vcmask 1043456   ;;  %v168_v1 = vld [vmem:[%s815_s1] sm:$0xff]  ;;  %vm170_vm2 = vcmask 31744  }
  0x14   : > { %553 = vmatprep.subr.mxu0 %v676_v0  ;;  %555 = vmatprep.mubr.msk.f32.mxu0 %vm677_vm0, %v676_v0  ;;  %v537_v2 = vld [vmem:[%s815_s1 + $0x8] sm:$0xff]  ;;  %v424_v6 = vld [vmem:[%s816_s2] sm:$0xff]  ;;  %vm166_vm3 = vcmask 130048   ;;  %v679_v7 = vmov 0   ;;  %v540_v8 = vld [vmem:[%s815_s1 + $0x10] sm:$0xff]  ;;  %vm254_vm4 = vcmask 130056   ;;  %v436_v30 = vlaneseq }
  0x15   : > { %558 = vmatprep.subr.mxu1 %v676_v0  ;;  %560 = vmatprep.mubr.msk.f32.mxu1 %vm677_vm0, %v676_v0  ;;  %s534_s25 = sshll.u32 %s163_s24, 2  ;;  %167 = vst.msk [vmem:[#allocation2] sm:$0xff] %vm166_vm3, %v676_v0  ;;  %vm421_vm5 = vcmask 121856   ;;  %vm443_vm6 = vcmask 57344   ;;  %s161_s24 = scalar_lea.vmem [#allocation3], %s533_s19 }
  0x16   : > { %s165_s28 = scalar_lea.vmem %s814_s0, %s534_s25  ;;  %612 = vset.pattern.permute.xlu1 %v679_v7  ;;  %613 = vset.pattern.permute.xlu0 %v679_v7  ;;  %v437_v31 = vand.u32 127, %v436_v30  ;;  %v439_v32 = vshrl.u32 %v436_v30, 7  ;;  %s470_s25 = sshll.u32 %s161_s24, 4  ;;  %s471_s25 = int_to_ptr.vmem [resolvable:$true] %s470_s25 }
  0x17   : > { %v169_v3 = vld [vmem:[%s165_s28] sm:$0xf]  ;;  %427 = vperm.xlu1 %612, %v424_v6   ;;  %s614_s30 = scalar_lea.vmem %s471_s25, 32  ;;  %s618_s16 = sshll.u32 %s681_s4, 4  ;;  %s619_s16 = int_to_ptr.vmem [resolvable:$false] %s618_s16 }
  0x18   : > { %v340_v4 = vld [vmem:[%s165_s28] sm:$0xf]  ;;  %554 = vmatpush3.msk.msra.mxu0 %vm174_vm1, %v169_v3  ;;  %v440_v33 = vsub.s32 %v437_v31, %v439_v32  ;;  %p615_p11 = scmp.ne.s32.totalorder %s471_s25, %s614_s30  ;;  %s620_s5 = scalar_lea.vmem %s619_s16, 64 }
  0x19   : > { %v258_v5 = vld [vmem:[%s165_s28] sm:$0xf]  ;;  %342 = vrot.lane.b32.xlu0 %v340_v4, %s678_s6  ;;  %556 = vmatmul.mubr.msk.f32.vlgmr.msra.gmra.mxu0 %vm170_vm2, %v168_v1  ;;  %s468_s28 = scalar_lea.hbm %s817_s3, %s544_s20  ;;  %p621_p0 = scmp.lt.s32.totalorder %s471_s25, %s619_s16 }
  0x1a   : > { %559 = vmatpush3.msk.msra.mxu1 %vm174_vm1, %v258_v5  ;;  %563 = vmatprep.subr.mxu0 %v676_v0  ;;  %p616_p12 = pnand %p615_p11, %p740_p5  ;;  %p622_p1 = scmp.lt.s32.totalorder %s620_s5, %s614_s30 }
  0x1b   : > { %561 = vmatmul.mubr.msk.f32.vlgmr.msra.gmra.mxu1 %vm170_vm2, %v537_v2  ;;  %565 = vmatprep.mubr.msk.f32.mxu0 %vm677_vm0, %v676_v0 }
  0x1c   : > { %v248_v14 = vld [vmem:[#allocation2] sm:$0xff]  ;;  %p617_p13 = pneg %p616_p12  ;;  %p623_p2 = por %p622_p1, %p621_p0 }
  0x1e   : > { %p624_p3 = pnand %p623_p2, %p617_p13 }
  0x8b   : > { %v343_v9 = vpop.permute.xlu0 %342 }
  0x8c   : > { %564 = vmatpush3.msk.msra.mxu0 %vm174_vm1, %v343_v9 }
  0x8d   : > { %566 = vmatmul.mubr.msk.f32.vlgmr.msra.gmra.mxu0 %vm170_vm2, %v540_v8 }
  0x92   : > { %v428_v23 = vpop.permute.xlu1 %427 }
  0xd9   : > { %v244_v10 = vpop.f32.mrf.mxu0 }
  0xda   : > { %250 = vrot.lane.b32.xlu0 %v244_v10, %s680_s11 }
  0xdb   : > { %v331_v11 = vpop.f32.mrf.mxu1  ;;  %v557_v12 = vpop.f32.mrf.mxu0 }
  0xdd   : > { %v562_v13 = vpop.f32.mrf.mxu1 }
 0x14c   : > { %v251_v15 = vpop.permute.xlu0 %250 }
 0x14d   : > { %v415_v16 = vpop.f32.mrf.mxu0  ;;  %v253_v17 = vadd.f32 %v251_v15, %v248_v14 }
 0x14f   : > { %v567_v18 = vpop.f32.mrf.mxu0  ;;  %255 = vst.msk [vmem:[#allocation2] sm:$0xff] %vm254_vm4, %v253_v17 }
 0x156   : > { %v335_v19 = vld [vmem:[#allocation2] sm:$0xff] }
 0x157   : > { %v336_v20 = vadd.f32 %v335_v19, %v331_v11 }
 0x159   : > { %337 = vst.msk [vmem:[#allocation2] sm:$0xff] %vm166_vm3, %v336_v20 }
 0x160   : > { %v419_v21 = vld [vmem:[#allocation2] sm:$0xff] }
 0x161   : > { %v420_v22 = vadd.f32 %v419_v21, %v415_v16 }
 0x163   : > { %422 = vst.msk [vmem:[#allocation2] sm:$0xff] %vm421_vm5, %v420_v22 }
 0x16a   : > { %v423_v24 = vld [vmem:[#allocation2] sm:$0xff] }
 0x16b   : > { %v430_v25 = vadd.f32 %v428_v23, %v423_v24 }
 0x16d   : > { %v431_v26 = vmax.f32 %v430_v25, 0.0 }
 0x16f   : > { %v432_v27 = vsel %vm166_vm3, %v431_v26, 0.0  ;;  %v445_v28 = vmul.f32 %v431_v26, %v431_v26 }
 0x170   : > { %433 = vadd.xlane.f32.xlu1 %v432_v27 }
 0x171   : > { %v446_v29 = vsel %vm166_vm3, %v445_v28, 0.0 }
 0x172   : > { %447 = vadd.xlane.f32.xlu0 %v446_v29 }
 0x1f9   : > { %v434_v34 = vpop.xlane.xlu1 %433 }
 0x1fa   : > { %v441_v35 = vrot.slane %v434_v34, %v440_v33 }
 0x1fb   : > { %v448_v36 = vpop.xlane.xlu0 %447 }
 0x1fc   : > { %444 = vst.msk [vmem:[%s161_s24] sm:$0x1] %vm443_vm6, %v441_v35  ;;  %v453_v37 = vrot.slane %v448_v36, %v440_v33 }
 0x1fe   : > { %455 = vst.msk [vmem:[%s161_s24 + $0x1] sm:$0x1] %vm443_vm6, %v453_v37 }
 0x1ff   : > { %627 = shalt.err (!%p624_p3)
}
 0x200   : > { %s628_s6 = scalar_lea.hbm %s468_s28, 32  ;;  %s632_s9 = scalar_lea.hbm %s817_s3, 64 }
 0x201   : > { %p629_p4 = scmp.ne.s32.totalorder %s468_s28, %s628_s6  ;;  %p633_p9 = scmp.lt.s32.totalorder %s468_s28, %s817_s3 }
 0x202   : > { %p634_p10 = scmp.lt.s32.totalorder %s632_s9, %s628_s6 }
 0x203   : > { %p630_p7 = pnand %p629_p4, %p740_p5 }
 0x204   : > { %p635_p11 = por %p634_p10, %p633_p9 }
 0x205   : > { %p631_p8 = pneg %p630_p7 }
 0x207   : > { %p636_p12 = pnand %p635_p11, %p631_p8 }
 0x209   : > { %639 = shalt.err (!%p636_p12)
}
 0x20a   : > { %568 = dma.vmem_to_hbm [thread:$0]  (%p740_p5), %s471_s25, 32, %s468_s28, %s457_s29  }
 0x20b PF: > { %p574_p13 = scmp.ge.s32.totalorder %s674_s15, 2  ;;  %s482_s17 = sand.u32 1, %s662_s12  }
 0x20c   : > { %s483_s19 = scalar_lea.sflag [#allocation4], %s482_s17 }
 0x20d   : > { %p571_p0 = pnand %p574_p13, %p744_p6 }
 0x20f   : > { %p572_p1 = pneg %p571_p0 }
 0x211   : > { %657 = dma.done.wait (%p572_p1), %s483_s19, 32  }
 0x212   : > { %659 = vsyncadd (%p572_p1), %s483_s19, 4294967264  ;;  %p13_p2 = scmp.ge.s32.totalorder %s727_s18, 4   ;;  %s820_s12 = smov %s666_s13 }
 0x213   : > { %s821_s13 = smov %s670_s14  ;;  %s822_s14 = smov %s738_s21 }
 0x214   : > { %s823_s15 = smov %s727_s18  ;;  %15 = sbr.rel (!%p13_p2) target bundleno = 3 (0x3), region = 69 }
 0x219   :  { %488 = vsyncpa [#allocation4], 1 }
 0x21a   :  { %490 = vsyncpa [#allocation4 + $0x1], 1 }

</bundles_post_ra>
